<compile_context>
chip_gen: v7x
topology: tpu7x:2x2x1
jax: 0.10.0
libtpu: 0.0.40
codegen_flags: <defaults>
</compile_context>

<pallas_src>
import jax
import jax.numpy as jnp
from jax.experimental import pallas as pl
from jax.experimental.pallas import tpu as pltpu


def _round_up(x, m):
    return ((x + m - 1) // m) * m


def _choose_batch_tile(B):
    """Batch tile: multiple of 128 lanes; >= 2 grid steps once B >= 256 so
    both v7x TensorCores get work under dimension_semantics=("parallel",)
    (neutral on single-TC v5e/v6e); capped at 2048 to amortize the ~0.35 us
    per-step overhead and per-step MXU weight re-pushes."""
    b128 = _round_up(B, 128)
    if b128 <= 128:
        return 128
    return min(2048, _round_up((b128 + 1) // 2, 128))


def _qnet_kernel(state_ref, action_ref, w1_ref, b1_ref, w2_ref, b2_ref,
                 w3_ref, b3_ref, o_ref, x_ref):
    """Fused 3-layer MLP on one batch tile of TB rows."""
    S = state_ref.shape[1]

    # fc1: in-kernel concat x = [state | action] staged through a small VMEM
    # scratch (two masked lane stores), then ONE combined MXU pass over W1.
    x_ref[:, :S] = state_ref[...]
    x_ref[:, S:] = action_ref[...]
    x = x_ref[...].astype(jnp.bfloat16)
    h1 = jnp.dot(x, w1_ref[...], preferred_element_type=jnp.float32)
    # bias + ReLU in f32, then materialize h1 exactly once, in bf16
    # (half-width spill -> less pressure on the single vector-store slot).
    h1 = jnp.maximum(h1 + b1_ref[...], 0.0).astype(jnp.bfloat16)

    # fc2
    h2 = jnp.dot(h1, w2_ref[...], preferred_element_type=jnp.float32)
    h2 = jnp.maximum(h2 + b2_ref[...], 0.0)

    # q head (out_features = 1): VPU multiply + XLU lane reduction instead of
    # a <1%-utilized MXU pass; write a lane-dense (1, TB) row (unmasked vst).
    w3 = w3_ref[...].astype(jnp.float32)                 # (1, H)
    q = jnp.sum(h2 * w3, axis=-1) + b3_ref[0, 0]         # (TB,)
    o_ref[...] = q[None, :].astype(o_ref.dtype)          # (1, TB)
    # TODO(synk): optional v7x-only fp8 weight path for fc2 once critic
    # quality under fp8 is validated against the f32 reference.


def qnetwork_forward(state, action, params):
    """Pallas-backed forward pass. state: [B, S], action: [B, A] -> [B, 1]."""
    w1, b1, w2, b2, w3, b3 = params
    B, S = state.shape
    A = action.shape[1]
    H = w2.shape[0]
    assert w1.shape[0] == S + A

    TB = _choose_batch_tile(B)
    B_pad = _round_up(B, TB)
    if B_pad != B:
        # Tail-tile handling: zero-pad rows; their (garbage) q outputs are
        # sliced off below -- keep that invariant if output plumbing changes.
        state = jnp.pad(state, ((0, B_pad - B), (0, 0)))
        action = jnp.pad(action, ((0, B_pad - B), (0, 0)))

    # Advisory cost so XLA can overlap surrounding SAC-step ops.
    flops = 2 * B_pad * ((S + A) * H + H * H + H)
    bytes_accessed = (B_pad * (S + A + 1) * 4
                      + ((S + A) * H + H * H + H) * 2
                      + (2 * H + 1) * 4)
    cost = pl.CostEstimate(flops=flops, transcendentals=0,
                           bytes_accessed=bytes_accessed)

    cp_kwargs = dict(dimension_semantics=("parallel",))   # megacore on v7x
    if TB >= 1024:
        # v5e's scoped-VMEM default is only 16 MiB; give big tiles headroom.
        cp_kwargs["vmem_limit_bytes"] = 48 * 1024 * 1024

    out = pl.pallas_call(
        _qnet_kernel,
        grid=(B_pad // TB,),
        in_specs=[
            pl.BlockSpec((TB, S), lambda i: (i, 0)),        # state tile
            pl.BlockSpec((TB, A), lambda i: (i, 0)),        # action tile
            pl.BlockSpec((S + A, H), lambda i: (0, 0)),     # W1 (combined)
            pl.BlockSpec((1, H), lambda i: (0, 0)),         # b1
            pl.BlockSpec((H, H), lambda i: (0, 0)),         # W2
            pl.BlockSpec((1, H), lambda i: (0, 0)),         # b2
            pl.BlockSpec((1, H), lambda i: (0, 0)),         # w3 (row vector)
            pl.BlockSpec(memory_space=pltpu.MemorySpace.SMEM),  # b3 scalar
        ],
        out_specs=pl.BlockSpec((1, TB), lambda i: (0, i)),
        out_shape=jax.ShapeDtypeStruct((1, B_pad), jnp.float32),
        scratch_shapes=[pltpu.VMEM((TB, S + A), jnp.float32)],  # x = [s | a]
        compiler_params=pltpu.CompilerParams(**cp_kwargs),
        cost_estimate=cost,
    )(state, action, w1, b1, w2, b2, w3, b3)

    return out[0, :B, None]


def init_qnetwork_params(key, state_dim, action_dim, hidden_dim=256):
    """Torch-style nn.Linear init (U(-1/sqrt(fan_in), +)), laid out for the
    kernel: single combined (S+A, H) W1, bf16 weights, f32 biases, w3 as a
    row vector, b3 as an SMEM scalar."""
    def linear(key, fan_in, fan_out):
        kw, kb = jax.random.split(key)
        bound = 1.0 / (fan_in ** 0.5)
        w = jax.random.uniform(kw, (fan_in, fan_out), jnp.float32, -bound, bound)
        b = jax.random.uniform(kb, (1, fan_out), jnp.float32, -bound, bound)
        return w, b

    k1, k2, k3 = jax.random.split(key, 3)
    w1, b1 = linear(k1, state_dim + action_dim, hidden_dim)
    w2, b2 = linear(k2, hidden_dim, hidden_dim)
    w3, b3 = linear(k3, hidden_dim, 1)

    w1 = w1.astype(jnp.bfloat16)                 # [S+A, H]
    w2 = w2.astype(jnp.bfloat16)                 # [H, H]
    w3_row = w3.T.astype(jnp.bfloat16)           # [1, H]
    b3 = b3.reshape(1, 1).astype(jnp.float32)    # scalar bias (SMEM)
    return (w1, b1, w2, b2, w3_row, b3)


def qnetwork_reference(state, action, params):
    """Pure-JAX reference using the same mixed precision as the kernel."""
    w1, b1, w2, b2, w3, b3 = params
    x = jnp.concatenate([state, action], axis=1).astype(jnp.bfloat16)
    h1 = jnp.dot(x, w1, preferred_element_type=jnp.float32)
    h1 = jnp.maximum(h1 + b1, 0.0).astype(jnp.bfloat16)
    h2 = jnp.dot(h1, w2, preferred_element_type=jnp.float32)
    h2 = jnp.maximum(h2 + b2, 0.0)
    q = jnp.sum(h2 * w3.astype(jnp.float32), axis=-1, keepdims=True) + b3[0, 0]
    return q


if __name__ == "__main__":
    key = jax.random.PRNGKey(0)
    k_params, k_state, k_action = jax.random.split(key, 3)

    batch = 2
    state_dim = 8
    action_dim = 8
    hidden_dim = 128  # small, lane-aligned stand-in for the default 256

    params = init_qnetwork_params(k_params, state_dim, action_dim, hidden_dim)
    state = jax.random.normal(k_state, (batch, state_dim), jnp.float32)
    action = jax.random.normal(k_action, (batch, action_dim), jnp.float32)

    q = qnetwork_forward(state, action, params)
    q = jax.block_until_ready(q)

    q_ref = qnetwork_reference(state, action, params)
    assert q.shape == (batch, 1), q.shape
    assert jnp.allclose(q, q_ref, atol=1e-2, rtol=1e-2), (q, q_ref)

    print("KERNEL_OK")
</pallas_src>

<mosaic_0001>
module attributes {stable_mosaic.version = 11 : i64} {
  func.func @_qnet_kernel(%arg0: i32, %arg1: memref<128x8xf32, #tpu.memory_space<vmem>>, %arg2: memref<128x8xf32, #tpu.memory_space<vmem>>, %arg3: memref<16x128xbf16, #tpu.memory_space<vmem>>, %arg4: memref<1x128xf32, #tpu.memory_space<vmem>>, %arg5: memref<128x128xbf16, #tpu.memory_space<vmem>>, %arg6: memref<1x128xf32, #tpu.memory_space<vmem>>, %arg7: memref<1x128xbf16, #tpu.memory_space<vmem>>, %arg8: memref<1x1xf32, #tpu.memory_space<smem>>, %arg9: memref<1x128xf32, #tpu.memory_space<vmem>>, %arg10: memref<128x16xf32, #tpu.memory_space<vmem>>) attributes {dimension_semantics = [#tpu.dimension_semantics<parallel>], iteration_bounds = array<i64: 1>, scalar_prefetch = 0 : i64, scratch_operands = 1 : i64, tpu.core_type = #tpu.core_type<tc>, window_params = [{transform_indices = @transform_0, window_bounds = array<i64: 128, 8>}, {transform_indices = @transform_1, window_bounds = array<i64: 128, 8>}, {pipeline_mode = #tpu.pipeline_mode<synchronous>, transform_indices = @transform_2, window_bounds = array<i64: 16, 128>}, {pipeline_mode = #tpu.pipeline_mode<synchronous>, transform_indices = @transform_3, window_bounds = array<i64: 1, 128>}, {pipeline_mode = #tpu.pipeline_mode<synchronous>, transform_indices = @transform_4, window_bounds = array<i64: 128, 128>}, {pipeline_mode = #tpu.pipeline_mode<synchronous>, transform_indices = @transform_5, window_bounds = array<i64: 1, 128>}, {pipeline_mode = #tpu.pipeline_mode<synchronous>, transform_indices = @transform_6, window_bounds = array<i64: 1, 128>}, {transform_indices = @transform_7, window_bounds = array<i64: 1, 1>}, {transform_indices = @transform_8, window_bounds = array<i64: 1, 128>}]} {
    %c0 = arith.constant 0 : index
    %c0_0 = arith.constant 0 : index
    %0 = vector.load %arg1[%c0, %c0_0] : memref<128x8xf32, #tpu.memory_space<vmem>>, vector<128x8xf32>
    %c0_1 = arith.constant 0 : index
    %c0_2 = arith.constant 0 : index
    %1 = vector.load %arg10[%c0_1, %c0_2] : memref<128x16xf32, #tpu.memory_space<vmem>>, vector<128x8xf32>
    tpu.vector_store %arg10[%c0_1, %c0_2], %0 {strides = array<i32>} : memref<128x16xf32, #tpu.memory_space<vmem>>, vector<128x8xf32>,
    %c0_3 = arith.constant 0 : index
    %c0_4 = arith.constant 0 : index
    %2 = vector.load %arg2[%c0_3, %c0_4] : memref<128x8xf32, #tpu.memory_space<vmem>>, vector<128x8xf32>
    %c0_5 = arith.constant 0 : index
    %c8 = arith.constant 8 : index
    %3 = vector.load %arg10[%c0_5, %c8] : memref<128x16xf32, #tpu.memory_space<vmem>>, vector<128x8xf32>
    tpu.vector_store %arg10[%c0_5, %c8], %2 {strides = array<i32>} : memref<128x16xf32, #tpu.memory_space<vmem>>, vector<128x8xf32>,
    %c0_6 = arith.constant 0 : index
    %c0_7 = arith.constant 0 : index
    %4 = vector.load %arg10[%c0_6, %c0_7] : memref<128x16xf32, #tpu.memory_space<vmem>>, vector<128x16xf32>
    %5 = arith.truncf %4 : vector<128x16xf32> to vector<128x16xbf16>
    %c0_8 = arith.constant 0 : index
    %c0_9 = arith.constant 0 : index
    %6 = vector.load %arg3[%c0_8, %c0_9] : memref<16x128xbf16, #tpu.memory_space<vmem>>, vector<16x128xbf16>
    %cst = arith.constant dense<0.000000e+00> : vector<128x128xf32>
    %7 = tpu.matmul %5, %6, %cst {dimension_numbers = #tpu.dot_dimension_numbers<[1], [0], [0], [1], [0, 0, 1, 1], [], []>} : vector<128x16xbf16>, vector<16x128xbf16>, vector<128x128xf32> -> vector<128x128xf32>
    %c0_10 = arith.constant 0 : index
    %c0_11 = arith.constant 0 : index
    %8 = vector.load %arg4[%c0_10, %c0_11] : memref<1x128xf32, #tpu.memory_space<vmem>>, vector<1x128xf32>
    %9 = vector.broadcast %8 : vector<1x128xf32> to vector<128x128xf32>
    %10 = arith.addf %7, %9 : vector<128x128xf32>
    %cst_12 = arith.constant 0.000000e+00 : f32
    %11 = vector.broadcast %cst_12 : f32 to vector<128x128xf32>
    %12 = arith.maximumf %10, %11 : vector<128x128xf32>
    %13 = arith.truncf %12 : vector<128x128xf32> to vector<128x128xbf16>
    %c0_13 = arith.constant 0 : index
    %c0_14 = arith.constant 0 : index
    %14 = vector.load %arg5[%c0_13, %c0_14] : memref<128x128xbf16, #tpu.memory_space<vmem>>, vector<128x128xbf16>
    %cst_15 = arith.constant dense<0.000000e+00> : vector<128x128xf32>
    %15 = tpu.matmul %13, %14, %cst_15 {dimension_numbers = #tpu.dot_dimension_numbers<[1], [0], [0], [1], [0, 0, 1, 1], [], []>} : vector<128x128xbf16>, vector<128x128xbf16>, vector<128x128xf32> -> vector<128x128xf32>
    %c0_16 = arith.constant 0 : index
    %c0_17 = arith.constant 0 : index
    %16 = vector.load %arg6[%c0_16, %c0_17] : memref<1x128xf32, #tpu.memory_space<vmem>>, vector<1x128xf32>
    %17 = vector.broadcast %16 : vector<1x128xf32> to vector<128x128xf32>
    %18 = arith.addf %15, %17 : vector<128x128xf32>
    %cst_18 = arith.constant 0.000000e+00 : f32
    %19 = vector.broadcast %cst_18 : f32 to vector<128x128xf32>
    %20 = arith.maximumf %18, %19 : vector<128x128xf32>
    %c0_19 = arith.constant 0 : index
    %c0_20 = arith.constant 0 : index
    %21 = vector.load %arg7[%c0_19, %c0_20] : memref<1x128xbf16, #tpu.memory_space<vmem>>, vector<1x128xbf16>
    %22 = arith.extf %21 : vector<1x128xbf16> to vector<1x128xf32>
    %23 = vector.broadcast %22 : vector<1x128xf32> to vector<128x128xf32>
    %24 = arith.mulf %20, %23 : vector<128x128xf32>
    %cst_21 = arith.constant dense<0.000000e+00> : vector<128xf32>
    %25 = vector.multi_reduction <add>, %24, %cst_21 [1] : vector<128x128xf32> to vector<128xf32>
    %c0_22 = arith.constant 0 : index
    %c0_23 = arith.constant 0 : index
    %26 = memref.load %arg8[%c0_22, %c0_23] : memref<1x1xf32, #tpu.memory_space<smem>>
    %27 = vector.broadcast %26 : f32 to vector<128xf32>
    %28 = arith.addf %25, %27 : vector<128xf32>
    %29 = vector.shape_cast %28 : vector<128xf32> to vector<1x128xf32>
    %c0_24 = arith.constant 0 : index
    %c0_25 = arith.constant 0 : index
    %30 = vector.load %arg9[%c0_24, %c0_25] : memref<1x128xf32, #tpu.memory_space<vmem>>, vector<1x128xf32>
    tpu.vector_store %arg9[%c0_24, %c0_25], %29 {strides = array<i32>} : memref<1x128xf32, #tpu.memory_space<vmem>>, vector<1x128xf32>,
    return
  }
  func.func @transform_0(%arg0: i32) -> (i32, i32) {
    %c0_i32 = arith.constant 0 : i32
    %c0_i32_0 = arith.constant 0 : i32
    return %arg0, %c0_i32 : i32, i32
  }
  func.func @transform_1(%arg0: i32) -> (i32, i32) {
    %c0_i32 = arith.constant 0 : i32
    %c0_i32_0 = arith.constant 0 : i32
    return %arg0, %c0_i32 : i32, i32
  }
  func.func @transform_2(%arg0: i32) -> (i32, i32) {
    %c0_i32 = arith.constant 0 : i32
    %c0_i32_0 = arith.constant 0 : i32
    %c0_i32_1 = arith.constant 0 : i32
    return %c0_i32, %c0_i32_0 : i32, i32
  }
  func.func @transform_3(%arg0: i32) -> (i32, i32) {
    %c0_i32 = arith.constant 0 : i32
    %c0_i32_0 = arith.constant 0 : i32
    %c0_i32_1 = arith.constant 0 : i32
    return %c0_i32, %c0_i32_0 : i32, i32
  }
  func.func @transform_4(%arg0: i32) -> (i32, i32) {
    %c0_i32 = arith.constant 0 : i32
    %c0_i32_0 = arith.constant 0 : i32
    %c0_i32_1 = arith.constant 0 : i32
    return %c0_i32, %c0_i32_0 : i32, i32
  }
  func.func @transform_5(%arg0: i32) -> (i32, i32) {
    %c0_i32 = arith.constant 0 : i32
    %c0_i32_0 = arith.constant 0 : i32
    %c0_i32_1 = arith.constant 0 : i32
    return %c0_i32, %c0_i32_0 : i32, i32
  }
  func.func @transform_6(%arg0: i32) -> (i32, i32) {
    %c0_i32 = arith.constant 0 : i32
    %c0_i32_0 = arith.constant 0 : i32
    %c0_i32_1 = arith.constant 0 : i32
    return %c0_i32, %c0_i32_0 : i32, i32
  }
  func.func @transform_7(%arg0: i32) -> (i32, i32) {
    %c0_i32 = arith.constant 0 : i32
    %c0_i32_0 = arith.constant 0 : i32
    %c0_i32_1 = arith.constant 0 : i32
    return %c0_i32, %c0_i32_0 : i32, i32
  }
  func.func @transform_8(%arg0: i32) -> (i32, i32) {
    %c0_i32 = arith.constant 0 : i32
    %c0_i32_0 = arith.constant 0 : i32
    return %c0_i32, %arg0 : i32, i32
  }
}

</mosaic_0001>

<bundles_post_ra>
// kernel: tpu_custom_call.1
= control target key start
LH: loop header
LB: loop body
LE: loop exit
PB: predicated region body
PF: predicated region fallthrough
CT: control target
= control target key end

     0   :  { %s890_s9 = smov 8   ;;  %vm48_vm0 = vcmask 64512   ;;  %s1259_s0 = inlined_call_operand.vmem [shape: f32[128,8], index: 0, kind: input, shape index: {}]   ;;  %s1260_s1 = inlined_call_operand.vmem [shape: f32[128,8], index: 1, kind: input, shape index: {}]   ;;  %s1261_s2 = inlined_call_operand.vmem [shape: bf16[16,128], index: 2, kind: input, shape index: {}]   ;;  %s1262_s3 = inlined_call_operand.vmem [shape: f32[1,128], index: 3, kind: input, shape index: {}]   ;;  %s1263_s4 = inlined_call_operand.vmem [shape: bf16[128,128], index: 4, kind: input, shape index: {}]   ;;  %s1264_s5 = inlined_call_operand.vmem [shape: f32[1,128], index: 5, kind: input, shape index: {}]   ;;  %s1265_s6 = inlined_call_operand.vmem [shape: bf16[1,128], index: 6, kind: input, shape index: {}]   ;;  %s1266_s7 = inlined_call_operand.<no memory space> [shape: f32[1,1], index: 7, kind: input, shape index: {}]   ;;  %s1267_s8 = inlined_call_operand.hbm [shape: f32[1,128], index: 8, kind: output, shape index: {}]  }
   0x1   :  { %v67_v0 = vld [vmem:[%s1260_s1 + $0x10] sm:$0xff]  ;;  %v65_v1 = vld [vmem:[%s1260_s1] sm:$0xff]  ;;  %v68_v2 = vld [vmem:[%s1260_s1 + $0x18] sm:$0xff] }
   0x2   :  { %101 = vrot.lane.b32.xlu1 %v67_v0, %s890_s9  ;;  %97 = vrot.lane.b32.xlu0 %v65_v1, %s890_s9  ;;  %v66_v3 = vld [vmem:[%s1260_s1 + $0x8] sm:$0xff]  ;;  %v69_v5 = vld [vmem:[%s1260_s1 + $0x20] sm:$0xff] }
   0x3   :  { %v70_v4 = vld [vmem:[%s1260_s1 + $0x28] sm:$0xff]  ;;  %v34_v6 = vld [vmem:[%s1259_s0 + $0x10] sm:$0xff]  ;;  %v32_v7 = vld [vmem:[%s1259_s0] sm:$0xff] }
   0x4   :  { %v35_v8 = vld [vmem:[%s1259_s0 + $0x18] sm:$0xff]  ;;  %51 = vst.msk [vmem:[#allocation2 + $0x10] sm:$0xff] %vm48_vm0, %v34_v6  ;;  %49 = vst.msk [vmem:[#allocation2] sm:$0xff] %vm48_vm0, %v32_v7  ;;  %v33_v9 = vld [vmem:[%s1259_s0 + $0x8] sm:$0xff] }
   0x5   :  { %52 = vst.msk [vmem:[#allocation2 + $0x18] sm:$0xff] %vm48_vm0, %v35_v8  ;;  %v37_v10 = vld [vmem:[%s1259_s0 + $0x28] sm:$0xff]  ;;  %v36_v11 = vld [vmem:[%s1259_s0 + $0x20] sm:$0xff]  ;;  %v72_v12 = vld [vmem:[%s1260_s1 + $0x38] sm:$0xff] }
   0x6   :  { %103 = vrot.lane.b32.xlu1 %v68_v2, %s890_s9  ;;  %99 = vrot.lane.b32.xlu0 %v66_v3, %s890_s9  ;;  %v71_v13 = vld [vmem:[%s1260_s1 + $0x30] sm:$0xff]  ;;  %50 = vst.msk [vmem:[#allocation2 + $0x8] sm:$0xff] %vm48_vm0, %v33_v9  ;;  %54 = vst.msk [vmem:[#allocation2 + $0x28] sm:$0xff] %vm48_vm0, %v37_v10  ;;  %v857_v14 = vld [vmem:[%s1261_s2] sm:$0xff]  }
   0x7   :  { %53 = vst.msk [vmem:[#allocation2 + $0x20] sm:$0xff] %vm48_vm0, %v36_v11  ;;  %v39_v15 = vld [vmem:[%s1259_s0 + $0x38] sm:$0xff]  ;;  %v38_v16 = vld [vmem:[%s1259_s0 + $0x30] sm:$0xff]  ;;  %789 = vmatprep.subr.bf16.mxu0 %v857_v14  ;;  %v41_v17 = vld [vmem:[%s1259_s0 + $0x48] sm:$0xff] }
   0x8   :  { %56 = vst.msk [vmem:[#allocation2 + $0x38] sm:$0xff] %vm48_vm0, %v39_v15  ;;  %55 = vst.msk [vmem:[#allocation2 + $0x30] sm:$0xff] %vm48_vm0, %v38_v16  ;;  %v40_v18 = vld [vmem:[%s1259_s0 + $0x40] sm:$0xff]  ;;  %v43_v19 = vld [vmem:[%s1259_s0 + $0x58] sm:$0xff]  ;;  %790 = vmatpush3.bf16.msra.mxu0 %v857_v14 }
   0x9   :  { %58 = vst.msk [vmem:[#allocation2 + $0x48] sm:$0xff] %vm48_vm0, %v41_v17  ;;  %57 = vst.msk [vmem:[#allocation2 + $0x40] sm:$0xff] %vm48_vm0, %v40_v18  ;;  %v42_v20 = vld [vmem:[%s1259_s0 + $0x50] sm:$0xff]  ;;  %v45_v21 = vld [vmem:[%s1259_s0 + $0x68] sm:$0xff] }
   0xa   :  { %107 = vrot.lane.b32.xlu1 %v70_v4, %s890_s9  ;;  %105 = vrot.lane.b32.xlu0 %v69_v5, %s890_s9  ;;  %60 = vst.msk [vmem:[#allocation2 + $0x58] sm:$0xff] %vm48_vm0, %v43_v19  ;;  %v74_v22 = vld [vmem:[%s1260_s1 + $0x48] sm:$0xff]  ;;  %v73_v23 = vld [vmem:[%s1260_s1 + $0x40] sm:$0xff]  ;;  %59 = vst.msk [vmem:[#allocation2 + $0x50] sm:$0xff] %vm48_vm0, %v42_v20 }
   0xb   :  { %62 = vst.msk [vmem:[#allocation2 + $0x68] sm:$0xff] %vm48_vm0, %v45_v21  ;;  %v44_v24 = vld [vmem:[%s1259_s0 + $0x60] sm:$0xff]  ;;  %v47_v25 = vld [vmem:[%s1259_s0 + $0x78] sm:$0xff]  ;;  %v46_v26 = vld [vmem:[%s1259_s0 + $0x70] sm:$0xff] }
   0xc   :  { %61 = vst.msk [vmem:[#allocation2 + $0x60] sm:$0xff] %vm48_vm0, %v44_v24  ;;  %v76_v27 = vld [vmem:[%s1260_s1 + $0x58] sm:$0xff]  ;;  %v75_v28 = vld [vmem:[%s1260_s1 + $0x50] sm:$0xff]  ;;  %64 = vst.msk [vmem:[#allocation2 + $0x78] sm:$0xff] %vm48_vm0, %v47_v25 }
   0xd   :  { %63 = vst.msk [vmem:[#allocation2 + $0x70] sm:$0xff] %vm48_vm0, %v46_v26 }
   0xe   :  { %111 = vrot.lane.b32.xlu1 %v72_v12, %s890_s9  ;;  %109 = vrot.lane.b32.xlu0 %v71_v13, %s890_s9 }
  0x12   :  { %115 = vrot.lane.b32.xlu1 %v74_v22, %s890_s9  ;;  %113 = vrot.lane.b32.xlu0 %v73_v23, %s890_s9 }
  0x13   :  { %14 = vsyncpa [#allocation5], 0  ;;  %v78_v29 = vld [vmem:[%s1260_s1 + $0x68] sm:$0xff]  ;;  %v77_v30 = vld [vmem:[%s1260_s1 + $0x60] sm:$0xff]  ;;  %vm145_vm1 = vcmask 130112   ;;  %vm201_vm2 = vcmask 130048  }
  0x14   :  { %v80_v31 = vld [vmem:[%s1260_s1 + $0x78] sm:$0xff]  ;;  %v79_v32 = vld [vmem:[%s1260_s1 + $0x70] sm:$0xff]  ;;  %v858_v33 = vld [vmem:[%s1263_s4] sm:$0xff]   ;;  %vm636_vm3 = vcmask 195712   ;;  %vm643_vm4 = vcmask 261312   ;;  %vm650_vm5 = vcmask 326912  }
  0x15   :  { %807 = vmatprep.subr.bf16.mxu0 %v858_v33  ;;  %v859_v34 = vld [vmem:[%s1263_s4 + $0x8] sm:$0xff]   ;;  %839 = vmatprep.subr.bf16.mxu1 %v858_v33  ;;  %v1077_v35 = vld [vmem:[%s1263_s4 + $0x10] sm:$0xff]   ;;  %v1083_v36 = vld [vmem:[%s1263_s4 + $0x18] sm:$0xff]   ;;  %vm657_vm6 = vcmask 392512   ;;  %vm664_vm7 = vcmask 458112   ;;  %vm671_vm8 = vcmask 523712  }
  0x16   :  { %119 = vrot.lane.b32.xlu1 %v76_v27, %s890_s9  ;;  %117 = vrot.lane.b32.xlu0 %v75_v28, %s890_s9  ;;  %v1090_v37 = vld [vmem:[%s1263_s4 + $0x20] sm:$0xff]   ;;  %v1097_v38 = vld [vmem:[%s1263_s4 + $0x28] sm:$0xff]   ;;  %vm678_vm9 = vcmask 589312   ;;  %vm685_vm10 = vcmask 654912   ;;  %vm692_vm11 = vcmask 720512   ;;  %vm699_vm12 = vcmask 786112  }
  0x17   :  { %847 = vmatpush3.bf16.msra.mxu1 %v858_v33  ;;  %v864_v15 = vld [vmem:[%s1263_s4 + $0x30] sm:$0xff]   ;;  %v865_v16 = vld [vmem:[%s1263_s4 + $0x38] sm:$0xff]   ;;  %v745_v17 = vld [vmem:[%s1262_s3] ss:$0 sm:$0xff]  ;;  %vm706_vm13 = vcmask 851712   ;;  %vm713_vm14 = vcmask 917312  }
  0x18   :  { %840 = vmatprep.subr.bf16.mxu1 %v859_v34  ;;  %vm720_vm15 = vcmask 982912   ;;  %vm727_vm0 = vcmask 1048512  }
  0x1a   :  { %123 = vrot.lane.b32.xlu1 %v78_v29, %s890_s9  ;;  %121 = vrot.lane.b32.xlu0 %v77_v30, %s890_s9 }
  0x1b   :  { %848 = vmatpush3.bf16.msra.mxu1 %v859_v34 }
  0x1c   :  { %841 = vmatprep.subr.bf16.mxu1 %v1077_v35 }
  0x1e   :  { %127 = vrot.lane.b32.xlu1 %v80_v31, %s890_s9  ;;  %125 = vrot.lane.b32.xlu0 %v79_v32, %s890_s9 }
  0x1f   :  { %849 = vmatpush3.bf16.msra.mxu1 %v1077_v35 }
  0x20   :  { %842 = vmatprep.subr.bf16.mxu1 %v1083_v36 }
  0x23   :  { %850 = vmatpush3.bf16.msra.mxu1 %v1083_v36 }
  0x24   :  { %843 = vmatprep.subr.bf16.mxu1 %v1090_v37 }
  0x27   :  { %851 = vmatpush3.bf16.msra.mxu1 %v1090_v37 }
  0x28   :  { %844 = vmatprep.subr.bf16.mxu1 %v1097_v38 }
  0x2b   :  { %852 = vmatpush3.bf16.msra.mxu1 %v1097_v38 }
  0x2c   :  { %845 = vmatprep.subr.bf16.mxu1 %v864_v15 }
  0x2f   :  { %853 = vmatpush3.bf16.msra.mxu1 %v864_v15 }
  0x30   :  { %846 = vmatprep.subr.bf16.mxu1 %v865_v16 }
  0x33   :  { %854 = vmatpush3.bf16.msra.mxu1 %v865_v16 }
  0x74   :  { %v102_v39 = vpop.permute.xlu1 %101  ;;  %v98_v40 = vpop.permute.xlu0 %97 }
  0x75   :  { %148 = vst.msk [vmem:[#allocation2 + $0x10] sm:$0xff] %vm145_vm1, %v102_v39  ;;  %146 = vst.msk [vmem:[#allocation2] sm:$0xff] %vm145_vm1, %v98_v40 }
  0x78   :  { %v104_v41 = vpop.permute.xlu1 %103  ;;  %v100_v42 = vpop.permute.xlu0 %99 }
  0x79   :  { %149 = vst.msk [vmem:[#allocation2 + $0x18] sm:$0xff] %vm145_vm1, %v104_v41  ;;  %147 = vst.msk [vmem:[#allocation2 + $0x8] sm:$0xff] %vm145_vm1, %v100_v42 }
  0x7c   :  { %v108_v43 = vpop.permute.xlu1 %107  ;;  %v106_v44 = vpop.permute.xlu0 %105  ;;  %v162_v45 = vld [vmem:[#allocation2] sm:$0xff]  ;;  %v164_v49 = vld [vmem:[#allocation2 + $0x10] sm:$0xff] }
  0x7d   :  { %151 = vst.msk [vmem:[#allocation2 + $0x28] sm:$0xff] %vm145_vm1, %v108_v43  ;;  %150 = vst.msk [vmem:[#allocation2 + $0x20] sm:$0xff] %vm145_vm1, %v106_v44 }
  0x80   :  { %v112_v46 = vpop.permute.xlu1 %111  ;;  %v110_v47 = vpop.permute.xlu0 %109  ;;  %v163_v48 = vld [vmem:[#allocation2 + $0x8] sm:$0xff]  ;;  %v165_v50 = vld [vmem:[#allocation2 + $0x18] sm:$0xff] }
  0x81   :  { %153 = vst.msk [vmem:[#allocation2 + $0x38] sm:$0xff] %vm145_vm1, %v112_v46  ;;  %152 = vst.msk [vmem:[#allocation2 + $0x30] sm:$0xff] %vm145_vm1, %v110_v47  ;;  %v178_v51 = vpack.c.bf16 %v163_v48, %v162_v45  ;;  %v179_v52 = vpack.c.bf16 %v165_v50, %v164_v49 }
  0x83   :  { %791 = vmatprep.mubr.msk.bf16.mxu0 %vm201_vm2, %v178_v51 }
  0x84   :  { %792 = vmatmul.mubr.msk.bf16.vlgmr.msra.gmra.mrb[0].mxu0 %vm201_vm2, %v179_v52  ;;  %v116_v53 = vpop.permute.xlu1 %115  ;;  %v114_v54 = vpop.permute.xlu0 %113  ;;  %v166_v55 = vld [vmem:[#allocation2 + $0x20] sm:$0xff]  ;;  %v167_v56 = vld [vmem:[#allocation2 + $0x28] sm:$0xff] }
  0x85   :  { %155 = vst.msk [vmem:[#allocation2 + $0x48] sm:$0xff] %vm145_vm1, %v116_v53  ;;  %154 = vst.msk [vmem:[#allocation2 + $0x40] sm:$0xff] %vm145_vm1, %v114_v54  ;;  %v180_v57 = vpack.c.bf16 %v167_v56, %v166_v55  ;;  %808 = vmatpush3.bf16.msra.mxu0 %v858_v33 }
  0x86   :  { %809 = vmatprep.subr.bf16.mxu0 %v859_v34 }
  0x87   :  { %795 = vmatprep.mubr.msk.bf16.mxu0 %vm201_vm2, %v180_v57 }
  0x88   :  { %v120_v58 = vpop.permute.xlu1 %119  ;;  %v118_v59 = vpop.permute.xlu0 %117  ;;  %v168_v60 = vld [vmem:[#allocation2 + $0x30] sm:$0xff]  ;;  %v169_v61 = vld [vmem:[#allocation2 + $0x38] sm:$0xff] }
  0x89   :  { %157 = vst.msk [vmem:[#allocation2 + $0x58] sm:$0xff] %vm145_vm1, %v120_v58  ;;  %156 = vst.msk [vmem:[#allocation2 + $0x50] sm:$0xff] %vm145_vm1, %v118_v59  ;;  %v181_v62 = vpack.c.bf16 %v169_v61, %v168_v60  ;;  %810 = vmatpush3.bf16.msra.mxu0 %v859_v34 }
  0x8a   :  { %811 = vmatprep.subr.bf16.mxu0 %v1077_v35 }
  0x8c   :  { %796 = vmatmul.mubr.msk.bf16.gmra.mrb[4].mxu0 %vm201_vm2, %v181_v62  ;;  %v124_v63 = vpop.permute.xlu1 %123  ;;  %v122_v0 = vpop.permute.xlu0 %121  ;;  %v170_v1 = vld [vmem:[#allocation2 + $0x40] sm:$0xff]  ;;  %v171_v2 = vld [vmem:[#allocation2 + $0x48] sm:$0xff] }
  0x8d   :  { %159 = vst.msk [vmem:[#allocation2 + $0x68] sm:$0xff] %vm145_vm1, %v124_v63  ;;  %158 = vst.msk [vmem:[#allocation2 + $0x60] sm:$0xff] %vm145_vm1, %v122_v0  ;;  %v182_v3 = vpack.c.bf16 %v171_v2, %v170_v1  ;;  %812 = vmatpush3.bf16.msra.mxu0 %v1077_v35 }
  0x8e   :  { %813 = vmatprep.subr.bf16.mxu0 %v1083_v36 }
  0x8f   :  { %799 = vmatprep.mubr.msk.bf16.mxu0 %vm201_vm2, %v182_v3 }
  0x90   :  { %v128_v4 = vpop.permute.xlu1 %127  ;;  %v126_v5 = vpop.permute.xlu0 %125  ;;  %v172_v6 = vld [vmem:[#allocation2 + $0x50] sm:$0xff]  ;;  %v173_v7 = vld [vmem:[#allocation2 + $0x58] sm:$0xff] }
  0x91   :  { %161 = vst.msk [vmem:[#allocation2 + $0x78] sm:$0xff] %vm145_vm1, %v128_v4  ;;  %160 = vst.msk [vmem:[#allocation2 + $0x70] sm:$0xff] %vm145_vm1, %v126_v5  ;;  %v183_v8 = vpack.c.bf16 %v173_v7, %v172_v6  ;;  %814 = vmatpush3.bf16.msra.mxu0 %v1083_v36 }
  0x92   :  { %815 = vmatprep.subr.bf16.mxu0 %v1090_v37 }
  0x94   :  { %800 = vmatmul.mubr.msk.bf16.gmra.mrb[8].mxu0 %vm201_vm2, %v183_v8  ;;  %v174_v9 = vld [vmem:[#allocation2 + $0x60] sm:$0xff]  ;;  %v175_v10 = vld [vmem:[#allocation2 + $0x68] sm:$0xff] }
  0x95   :  { %v184_v11 = vpack.c.bf16 %v175_v10, %v174_v9  ;;  %816 = vmatpush3.bf16.msra.mxu0 %v1090_v37  ;;  %v533_v10 = vlaneseq }
  0x96   :  { %817 = vmatprep.subr.bf16.mxu0 %v1097_v38 }
  0x97   :  { %803 = vmatprep.mubr.msk.bf16.mxu0 %vm201_vm2, %v184_v11  ;;  %v1144_v11 = vshrl.u32 %v533_v10, 7 }
  0x98   :  { %v176_v12 = vld [vmem:[#allocation2 + $0x70] sm:$0xff]  ;;  %v177_v13 = vld [vmem:[#allocation2 + $0x78] sm:$0xff] }
  0x99   :  { %v185_v14 = vpack.c.bf16 %v177_v13, %v176_v12  ;;  %818 = vmatpush3.bf16.msra.mxu0 %v1097_v38  ;;  %v531_v12 = vld [vmem:[%s1265_s6] sm:$0x1] }
  0x9a   :  { %819 = vmatprep.subr.bf16.mxu0 %v864_v15  ;;  %v532_v13 = vunpack.c.l.bf16 %v531_v12 }
  0x9c   :  { %804 = vmatmul.mubr.msk.bf16.gmra.mrb[12].mxu0 %vm201_vm2, %v185_v14  ;;  %v535_v14 = vsub.s32 0, %v1144_v11 }
  0x9d   :  { %820 = vmatpush3.bf16.msra.mxu0 %v864_v15  ;;  %v1153_v15 = vld [vmem:[%s1264_s5] ss:$0 sm:$0xff] }
  0x9e   :  { %821 = vmatprep.subr.bf16.mxu0 %v865_v16 }
  0xa1   :  { %822 = vmatpush3.bf16.msra.mxu0 %v865_v16 }
 0x157   :  { %v793_v18 = vpop.f32.mrb[0].mxu0 }
 0x158   :  { %v269_v19 = vadd.f32 %v793_v18, %v745_v17  ;;  %v260_v20 = vpop.f32.mrb[1].mxu0 }
 0x159   :  { %v261_v21 = vadd.f32 %v745_v17, %v260_v20  ;;  %v794_v22 = vpop.f32.mrb[2].mxu0 }
 0x15a   :  { %v272_v23 = vadd.f32 %v794_v22, %v745_v17  ;;  %v263_v24 = vpop.f32.mrb[3].mxu0  ;;  %v325_v26 = vmax.f32 %v269_v19, 0.0  ;;  %v1156_v19 = vrot.slane %v532_v13, %v535_v14 }
 0x15b   :  { %v264_v25 = vadd.f32 %v745_v17, %v263_v24  ;;  %v323_v28 = vmax.f32 %v261_v21, 0.0 }
 0x15c   :  { %v326_v27 = vmax.f32 %v272_v23, 0.0 }
 0x15d   :  { %v324_v29 = vmax.f32 %v264_v25, 0.0 }
 0x15e   :  { %v340_v30 = vpack.c.bf16 %v326_v27, %v325_v26 }
 0x15f   :  { %v339_v31 = vpack.c.bf16 %v324_v29, %v323_v28  ;;  %v797_v32 = vpop.f32.mrb[4].mxu0 }
 0x160   :  { %v285_v33 = vadd.f32 %v797_v32, %v745_v17  ;;  %v276_v34 = vpop.f32.mrb[5].mxu0 }
 0x161   :  { %v277_v35 = vadd.f32 %v745_v17, %v276_v34  ;;  %v798_v36 = vpop.f32.mrb[6].mxu0  ;;  %823 = vmatprep.mubr.bf16.mxu0 %v339_v31 }
 0x162   :  { %v329_v37 = vmax.f32 %v285_v33, 0.0  ;;  %v288_v38 = vadd.f32 %v798_v36, %v745_v17  ;;  %v279_v39 = vpop.f32.mrb[7].mxu0  ;;  %824 = vmatmul.mubr.bf16.vlgmr.msra.gmra.mrb[16].mxu0 %v340_v30 }
 0x163   :  { %v280_v40 = vadd.f32 %v745_v17, %v279_v39  ;;  %v327_v42 = vmax.f32 %v277_v35, 0.0 }
 0x164   :  { %v330_v41 = vmax.f32 %v288_v38, 0.0 }
 0x165   :  { %v328_v43 = vmax.f32 %v280_v40, 0.0 }
 0x166   :  { %v342_v44 = vpack.c.bf16 %v330_v41, %v329_v37 }
 0x167   :  { %v801_v45 = vpop.f32.mrb[8].mxu0  ;;  %v341_v46 = vpack.c.bf16 %v328_v43, %v327_v42 }
 0x168   :  { %v301_v47 = vadd.f32 %v801_v45, %v745_v17  ;;  %v292_v48 = vpop.f32.mrb[9].mxu0 }
 0x169   :  { %v293_v49 = vadd.f32 %v745_v17, %v292_v48  ;;  %v802_v50 = vpop.f32.mrb[10].mxu0  ;;  %827 = vmatprep.mubr.bf16.mxu1 %v341_v46 }
 0x16a   :  { %v333_v51 = vmax.f32 %v301_v47, 0.0  ;;  %v304_v52 = vadd.f32 %v802_v50, %v745_v17  ;;  %v295_v53 = vpop.f32.mrb[11].mxu0  ;;  %828 = vmatmul.mubr.bf16.vlgmr.msra.gmra.mrb[0].mxu1 %v342_v44 }
 0x16b   :  { %v296_v54 = vadd.f32 %v745_v17, %v295_v53  ;;  %v331_v56 = vmax.f32 %v293_v49, 0.0 }
 0x16c   :  { %v334_v55 = vmax.f32 %v304_v52, 0.0 }
 0x16d   :  { %v332_v57 = vmax.f32 %v296_v54, 0.0 }
 0x16e   :  { %v344_v58 = vpack.c.bf16 %v334_v55, %v333_v51 }
 0x16f   :  { %v343_v59 = vpack.c.bf16 %v332_v57, %v331_v56  ;;  %v805_v60 = vpop.f32.mrb[12].mxu0 }
 0x170   :  { %v317_v61 = vadd.f32 %v805_v60, %v745_v17  ;;  %v308_v62 = vpop.f32.mrb[13].mxu0 }
 0x171   :  { %v309_v63 = vadd.f32 %v745_v17, %v308_v62  ;;  %v806_v0 = vpop.f32.mrb[14].mxu0  ;;  %831 = vmatprep.mubr.bf16.mxu1 %v343_v59 }
 0x172   :  { %v337_v1 = vmax.f32 %v317_v61, 0.0  ;;  %v320_v2 = vadd.f32 %v806_v0, %v745_v17  ;;  %v311_v3 = vpop.f32.mrb[15].mxu0  ;;  %832 = vmatmul.mubr.bf16.gmra.mrb[4].mxu1 %v344_v58 }
 0x173   :  { %v312_v4 = vadd.f32 %v745_v17, %v311_v3  ;;  %v335_v6 = vmax.f32 %v309_v63, 0.0 }
 0x174   :  { %v338_v5 = vmax.f32 %v320_v2, 0.0 }
 0x175   :  { %v336_v7 = vmax.f32 %v312_v4, 0.0 }
 0x176   :  { %v346_v8 = vpack.c.bf16 %v338_v5, %v337_v1 }
 0x177   :  { %v345_v9 = vpack.c.bf16 %v336_v7, %v335_v6 }
 0x179   :  { %835 = vmatprep.mubr.bf16.mxu1 %v345_v9 }
 0x17a   :  { %836 = vmatmul.mubr.bf16.gmra.mrb[8].mxu1 %v346_v8 }
 0x235   :  { %v825_v16 = vpop.f32.mrb[16].mxu0 }
 0x236   :  { %v461_v17 = vadd.f32 %v825_v16, %v1153_v15  ;;  %v452_v18 = vpop.f32.mrb[17].mxu0 }
 0x237   :  { %v453_v20 = vadd.f32 %v1153_v15, %v452_v18  ;;  %v826_v21 = vpop.f32.mrb[18].mxu0 }
 0x238   :  { %v517_v22 = vmax.f32 %v461_v17, 0.0  ;;  %v455_v23 = vpop.f32.mrb[19].mxu0  ;;  %v464_v26 = vadd.f32 %v826_v21, %v1153_v15 }
 0x239   :  { %v456_v24 = vadd.f32 %v1153_v15, %v455_v23  ;;  %v515_v25 = vmax.f32 %v453_v20, 0.0 }
 0x23a   :  { %v539_v27 = vmul.f32 %v1156_v19, %v517_v22  ;;  %v518_v31 = vmax.f32 %v464_v26, 0.0 }
 0x23b   :  { %v516_v28 = vmax.f32 %v456_v24, 0.0  ;;  %v537_v34 = vmul.f32 %v1156_v19, %v515_v25  ;;  %v1196_v25 = vstv %s1266_s7  ;;  %s891_s7 = smov [#allocation4]  }
 0x23c   :  { %557 = vadd.xlane.f32.xlu0 %v539_v27  ;;  %v540_v44 = vmul.f32 %v1156_v19, %v518_v31  ;;  %s737_s22 = sshll.u32 %s891_s7, 4  ;;  %s738_s22 = int_to_ptr.vmem [resolvable:$true] %s737_s22 }
 0x23d   :  { %v829_v29 = vpop.f32.mrb[0].mxu1  ;;  %v538_v30 = vmul.f32 %v1156_v19, %v516_v28  ;;  %s866_s23 = scalar_lea.vmem %s738_s22, 16  ;;  %s870_s24 = scalar_lea.vmem %s738_s22, 32 }
 0x23e   :  { %v477_v32 = vadd.f32 %v829_v29, %v1153_v15  ;;  %v468_v33 = vpop.f32.mrb[1].mxu1  ;;  %p867_p0 = scmp.ne.s32.totalorder %s738_s22, %s866_s23  ;;  %p871_p1 = scmp.lt.s32.totalorder %s738_s22, %s738_s22 }
 0x23f   :  { %v469_v35 = vadd.f32 %v1153_v15, %v468_v33  ;;  %v830_v36 = vpop.f32.mrb[2].mxu1  ;;  %555 = vadd.xlane.f32.xlu1 %v538_v30  ;;  %p872_p2 = scmp.lt.s32.totalorder %s870_s24, %s866_s23 }
 0x240   :  { %v521_v37 = vmax.f32 %v477_v32, 0.0  ;;  %v480_v38 = vadd.f32 %v830_v36, %v1153_v15  ;;  %v471_v39 = vpop.f32.mrb[3].mxu1  ;;  %553 = vadd.xlane.f32.xlu0 %v537_v34 }
 0x241   :  { %v472_v40 = vadd.f32 %v1153_v15, %v471_v39  ;;  %v519_v41 = vmax.f32 %v469_v35, 0.0  ;;  %p873_p3 = por %p872_p2, %p871_p1 }
 0x242   :  { %v522_v42 = vmax.f32 %v480_v38, 0.0  ;;  %v543_v43 = vmul.f32 %v1156_v19, %v521_v37 }
 0x243   :  { %v520_v45 = vmax.f32 %v472_v40, 0.0  ;;  %v541_v49 = vmul.f32 %v1156_v19, %v519_v41  ;;  %p874_p4 = pnand %p873_p3, %p867_p0 }
 0x244   :  { %565 = vadd.xlane.f32.xlu1 %v543_v43  ;;  %559 = vadd.xlane.f32.xlu0 %v540_v44  ;;  %v544_v50 = vmul.f32 %v1156_v19, %v522_v42 }
 0x245   :  { %v833_v46 = vpop.f32.mrb[4].mxu1  ;;  %v542_v56 = vmul.f32 %v1156_v19, %v520_v45 }
 0x246   :  { %v493_v47 = vadd.f32 %v833_v46, %v1153_v15  ;;  %v484_v48 = vpop.f32.mrb[5].mxu1 }
 0x247   :  { %v485_v51 = vadd.f32 %v1153_v15, %v484_v48  ;;  %v834_v52 = vpop.f32.mrb[6].mxu1 }
 0x248   :  { %v525_v53 = vmax.f32 %v493_v47, 0.0  ;;  %v496_v54 = vadd.f32 %v834_v52, %v1153_v15  ;;  %v487_v55 = vpop.f32.mrb[7].mxu1  ;;  %561 = vadd.xlane.f32.xlu1 %v541_v49  ;;  %567 = vadd.xlane.f32.xlu0 %v544_v50 }
 0x249   :  { %v523_v57 = vmax.f32 %v485_v51, 0.0  ;;  %v488_v59 = vadd.f32 %v1153_v15, %v487_v55 }
 0x24a   :  { %v526_v58 = vmax.f32 %v496_v54, 0.0  ;;  %v547_v60 = vmul.f32 %v1156_v19, %v525_v53 }
 0x24b   :  { %v524_v62 = vmax.f32 %v488_v59, 0.0  ;;  %v545_v0 = vmul.f32 %v1156_v19, %v523_v57 }
 0x24c   :  { %573 = vadd.xlane.f32.xlu1 %v547_v60  ;;  %563 = vadd.xlane.f32.xlu0 %v542_v56  ;;  %v548_v1 = vmul.f32 %v1156_v19, %v526_v58 }
 0x24d   :  { %v837_v61 = vpop.f32.mrb[8].mxu1  ;;  %v546_v9 = vmul.f32 %v1156_v19, %v524_v62 }
 0x24e   :  { %v500_v63 = vpop.f32.mrb[9].mxu1  ;;  %v509_v2 = vadd.f32 %v837_v61, %v1153_v15 }
 0x24f   :  { %v501_v3 = vadd.f32 %v1153_v15, %v500_v63  ;;  %v838_v4 = vpop.f32.mrb[10].mxu1 }
 0x250   :  { %v503_v5 = vpop.f32.mrb[11].mxu1  ;;  %569 = vadd.xlane.f32.xlu1 %v545_v0  ;;  %575 = vadd.xlane.f32.xlu0 %v548_v1  ;;  %v512_v8 = vadd.f32 %v838_v4, %v1153_v15  ;;  %v529_v12 = vmax.f32 %v509_v2, 0.0 }
 0x251   :  { %v527_v6 = vmax.f32 %v501_v3, 0.0  ;;  %v504_v7 = vadd.f32 %v1153_v15, %v503_v5  ;;  %v1190_v15 = vand.u32 127, %v533_v10 }
 0x252   :  { %v530_v17 = vmax.f32 %v512_v8, 0.0  ;;  %v551_v18 = vmul.f32 %v1156_v19, %v529_v12 }
 0x253   :  { %v528_v13 = vmax.f32 %v504_v7, 0.0  ;;  %v549_v14 = vmul.f32 %v1156_v19, %v527_v6  ;;  %v625_v22 = vadd.s32 4294967288, %v1190_v15  ;;  %v638_v26 = vadd.s32 4294967272, %v1190_v15 }
 0x254   :  { %571 = vadd.xlane.f32.xlu0 %v546_v9  ;;  %v552_v20 = vmul.f32 %v1156_v19, %v530_v17  ;;  %v623_v28 = vsub.s32 %v1190_v15, %v1144_v11  ;;  %v631_v29 = vadd.s32 4294967280, %v1190_v15  ;;  %v645_v32 = vadd.s32 4294967264, %v1190_v15 }
 0x255   :  { %577 = vadd.xlane.f32.xlu1 %v549_v14  ;;  %v550_v16 = vmul.f32 %v1156_v19, %v528_v13  ;;  %v628_v27 = vsub.s32 %v625_v22, %v1144_v11  ;;  %v659_v33 = vadd.s32 4294967248, %v1190_v15  ;;  %v641_v34 = vsub.s32 %v638_v26, %v1144_v11 }
 0x256   :  { %v652_v38 = vadd.s32 4294967256, %v1190_v15  ;;  %v634_v39 = vsub.s32 %v631_v29, %v1144_v11  ;;  %v648_v41 = vsub.s32 %v645_v32, %v1144_v11  ;;  %v666_v45 = vadd.s32 4294967240, %v1190_v15 }
 0x257   :  { %v662_v46 = vsub.s32 %v659_v33, %v1144_v11  ;;  %v673_v55 = vadd.s32 4294967232, %v1190_v15  ;;  %v687_v59 = vadd.s32 4294967216, %v1190_v15  ;;  %v680_v63 = vadd.s32 4294967224, %v1190_v15 }
 0x258   :  { %579 = vadd.xlane.f32.xlu0 %v550_v16  ;;  %v655_v49 = vsub.s32 %v652_v38, %v1144_v11  ;;  %v669_v56 = vsub.s32 %v666_v45, %v1144_v11  ;;  %v694_v4 = vadd.s32 4294967208, %v1190_v15  ;;  %v701_v9 = vadd.s32 4294967200, %v1190_v15 }
 0x259   :  { %581 = vadd.xlane.f32.xlu1 %v551_v18  ;;  %v676_v2 = vsub.s32 %v673_v55, %v1144_v11  ;;  %v690_v13 = vsub.s32 %v687_v59, %v1144_v11  ;;  %v683_v14 = vsub.s32 %v680_v63, %v1144_v11  ;;  %v708_v16 = vadd.s32 4294967192, %v1190_v15 }
 0x25a   :  { %v715_v22 = vadd.s32 4294967184, %v1190_v15 }
 0x25b   :  { %v711_v29 = vsub.s32 %v708_v16, %v1144_v11 }
 0x25c   :  { %583 = vadd.xlane.f32.xlu0 %v552_v20  ;;  %v697_v20 = vsub.s32 %v694_v4, %v1144_v11 }
 0x2c9   :  { %v558_v21 = vpop.xlane.xlu0 %557 }
 0x2ca   :  { %v589_v40 = vadd.f32 %v1196_v25, %v558_v21 }
 0x2cc   :  { %v556_v23 = vpop.xlane.xlu1 %555  ;;  %v635_v50 = vrot.slane %v589_v40, %v634_v39 }
 0x2cd   :  { %v554_v24 = vpop.xlane.xlu0 %553  ;;  %v588_v19 = vadd.f32 %v1196_v25, %v556_v23 }
 0x2ce   :  { %v587_v10 = vadd.f32 %v1196_v25, %v554_v24 }
 0x2cf   :  { %v629_v35 = vrot.slane %v588_v19, %v628_v27  ;;  %v704_v19 = vsub.s32 %v701_v9, %v1144_v11 }
 0x2d0   :  { %v624_v36 = vrot.slane %v587_v10, %v623_v28 }
 0x2d1   :  { %v566_v30 = vpop.xlane.xlu1 %565  ;;  %v560_v31 = vpop.xlane.xlu0 %559 }
 0x2d2   :  { %v590_v37 = vadd.f32 %v1196_v25, %v560_v31  ;;  %v630_v47 = vsel %vm145_vm1, %v629_v35, %v624_v36  ;;  %v593_v51 = vadd.f32 %v1196_v25, %v566_v30  ;;  %v722_v30 = vadd.s32 4294967176, %v1190_v15 }
 0x2d3   :  { %v637_v58 = vsel %vm636_vm3, %v635_v50, %v630_v47 }
 0x2d4   :  { %v642_v48 = vrot.slane %v590_v37, %v641_v34  ;;  %v663_v0 = vrot.slane %v593_v51, %v662_v46  ;;  %v718_v34 = vsub.s32 %v715_v22, %v1144_v11  ;;  %v725_v15 = vsub.s32 %v722_v30, %v1144_v11 }
 0x2d5   :  { %v562_v42 = vpop.xlane.xlu1 %561  ;;  %v568_v43 = vpop.xlane.xlu0 %567 }
 0x2d6   :  { %v591_v44 = vadd.f32 %v1196_v25, %v562_v42  ;;  %v644_v60 = vsel %vm643_vm4, %v642_v48, %v637_v58  ;;  %v594_v61 = vadd.f32 %v1196_v25, %v568_v43 }
 0x2d8   :  { %v649_v52 = vrot.slane %v591_v44, %v648_v41  ;;  %v670_v12 = vrot.slane %v594_v61, %v669_v56 }
 0x2d9   :  { %v574_v53 = vpop.xlane.xlu1 %573  ;;  %v564_v54 = vpop.xlane.xlu0 %563 }
 0x2da   :  { %v592_v57 = vadd.f32 %v1196_v25, %v564_v54  ;;  %v651_v1 = vsel %vm650_vm5, %v649_v52, %v644_v60  ;;  %v597_v17 = vadd.f32 %v1196_v25, %v574_v53 }
 0x2dc   :  { %v656_v62 = vrot.slane %v592_v57, %v655_v49  ;;  %v691_v31 = vrot.slane %v597_v17, %v690_v13 }
 0x2dd   :  { %v570_v3 = vpop.xlane.xlu1 %569  ;;  %v576_v5 = vpop.xlane.xlu0 %575 }
 0x2de   :  { %v658_v6 = vsel %vm657_vm6, %v656_v62, %v651_v1  ;;  %v595_v7 = vadd.f32 %v1196_v25, %v570_v3  ;;  %v598_v24 = vadd.f32 %v1196_v25, %v576_v5 }
 0x2df   :  { %v665_v8 = vsel %vm664_vm7, %v663_v0, %v658_v6 }
 0x2e0   :  { %v677_v18 = vrot.slane %v595_v7, %v676_v2  ;;  %v672_v23 = vsel %vm671_vm8, %v670_v12, %v665_v8  ;;  %v698_v35 = vrot.slane %v598_v24, %v697_v20 }
 0x2e1   :  { %v572_v21 = vpop.xlane.xlu0 %571 }
 0x2e2   :  { %v596_v26 = vadd.f32 %v1196_v25, %v572_v21  ;;  %v578_v27 = vpop.xlane.xlu1 %577  ;;  %v679_v32 = vsel %vm678_vm9, %v677_v18, %v672_v23 }
 0x2e3   :  { %v599_v28 = vadd.f32 %v1196_v25, %v578_v27 }
 0x2e4   :  { %v684_v10 = vrot.slane %v596_v26, %v683_v14 }
 0x2e5   :  { %v580_v33 = vpop.xlane.xlu0 %579  ;;  %v705_v40 = vrot.slane %v599_v28, %v704_v19 }
 0x2e6   :  { %v686_v36 = vsel %vm685_vm10, %v684_v10, %v679_v32  ;;  %v600_v37 = vadd.f32 %v1196_v25, %v580_v33  ;;  %v582_v38 = vpop.xlane.xlu1 %581 }
 0x2e7   :  { %v693_v39 = vsel %vm692_vm11, %v691_v31, %v686_v36  ;;  %v601_v41 = vadd.f32 %v1196_v25, %v582_v38 }
 0x2e8   :  { %v700_v42 = vsel %vm699_vm12, %v698_v35, %v693_v39  ;;  %v712_v43 = vrot.slane %v600_v37, %v711_v29 }
 0x2e9   :  { %v707_v44 = vsel %vm706_vm13, %v705_v40, %v700_v42  ;;  %v719_v45 = vrot.slane %v601_v41, %v718_v34  ;;  %v584_v46 = vpop.xlane.xlu0 %583 }
 0x2ea   :  { %v602_v47 = vadd.f32 %v1196_v25, %v584_v46  ;;  %v714_v48 = vsel %vm713_vm14, %v712_v43, %v707_v44 }
 0x2eb   :  { %v721_v50 = vsel %vm720_vm15, %v719_v45, %v714_v48 }
 0x2ec   :  { %v726_v49 = vrot.slane %v602_v47, %v725_v15 }
 0x2ee   :  { %v728_v51 = vsel %vm727_vm0, %v726_v49, %v721_v50 }
 0x2ef   :  { %730 = vst [vmem:[#allocation4] sm:$0x1] %v728_v51 }
 0x2f0   :  { %877 = shalt.err (!%p874_p4)
}
 0x2f1   :  { %s878_s27 = scalar_lea.hbm %s1267_s8, 16 }
 0x2f2   :  { %p879_p5 = scmp.ne.s32.totalorder %s1267_s8, %s878_s27  ;;  %p882_p6 = scmp.lt.u32.totalorder %s878_s27, %s1267_s8 }
 0x2f4   :  { %p884_p7 = pnand %p882_p6, %p879_p5 }
 0x2f6   :  { %887 = shalt.err (!%p884_p7)
}
 0x2f7   :  { %740 = dma.vmem_to_hbm [thread:$0]  %s738_s22, 16, %s1267_s8, [#allocation5]  }
 0x2f8   :  { %888 = dma.done.wait [#allocation5], 16  }
 0x2f9   :  { %889 = vsyncadd [#allocation5], 4294967280 }
 0x2fa   :  { %744 = vsyncpa [#allocation5], 1 }

</bundles_post_ra>
